<compile_context>
chip_gen: v7x
topology: tpu7x:2x2x1
jax: 0.10.0
libtpu: 0.0.40
codegen_flags: <defaults>
</compile_context>

<pallas_src>
import math

import jax
import jax.numpy as jnp
from jax import lax
from jax.experimental import pallas as pl
from jax.experimental.pallas import tpu as pltpu


def _vmem_capacity_bytes() -> int:
    """Per-core VMEM capacity; conservative default if the query fails."""
    try:
        cap = int(pltpu.get_tpu_info().vmem_capacity_bytes)
        if cap > 0:
            return cap
    except Exception:
        pass
    return 64 * 1024 * 1024  # v7x per-TC size (smallest of v5e/v6e/v7x)


def _make_swap_kernel(perm):
    def kernel(x_ref, o_ref):
        # Intra-tile axis permutation; inter-tile swap is done by the
        # BlockSpec index maps.  `perm` is its own inverse (it's a swap).
        o_ref[...] = jnp.transpose(x_ref[...], perm)
    return kernel


def _round_tile(dim, align, target):
    """Legal tile along a dim of extent `dim`.

    Returns the full extent when no shrink is needed (or possible), otherwise
    the largest multiple of `align` that is <= max(target, align) and < dim.
    Non-divisible dims get a ragged edge block (cdiv grid + Pallas masking).
    """
    if target >= dim or dim <= align:
        return dim
    t = max(target, align)
    t = (t // align) * align
    return t  # guaranteed >= align and < dim here


def _fixed_arity(fn, r):
    # Index maps with an explicit positional signature (one arg per grid dim).
    if r == 2:
        return lambda a, b: fn(a, b)
    if r == 3:
        return lambda a, b, c: fn(a, b, c)
    if r == 4:
        return lambda a, b, c, d: fn(a, b, c, d)
    if r == 5:
        return lambda a, b, c, d, e: fn(a, b, c, d, e)
    raise ValueError(f"unsupported canonical rank: {r}")


def swap_axes_pallas(x: jax.Array, axis0: int, axis1: int) -> jax.Array:
    """Equivalent of torch.swapaxes(x, axis0, axis1) as a Pallas TPU kernel."""
    ndim = x.ndim
    if ndim == 0:
        return x
    a0 = axis0 % ndim
    a1 = axis1 % ndim
    if a0 == a1:
        return x
    if a0 > a1:
        a0, a1 = a1, a0

    shape = x.shape
    out_shape_full = list(shape)
    out_shape_full[a0], out_shape_full[a1] = out_shape_full[a1], out_shape_full[a0]
    out_shape_full = tuple(out_shape_full)

    itemsize = jnp.dtype(x.dtype).itemsize

    # --- sub-32-bit dtypes with an untouched last dim: pack pairs/quads of the
    #     lane into one u32 word (exact bit reinterpretation) so the sublane
    #     relayout runs at 32-bit granularity.  Only when the packed lane stays
    #     a multiple of 128 so stores remain unmasked. -------------------------
    if itemsize < 4 and a1 < ndim - 1:
        ratio = 4 // itemsize
        tail = math.prod(shape[a1 + 1:])
        if shape[-1] % ratio == 0 and (tail // ratio) % 128 == 0:
            packed = lax.bitcast_convert_type(
                x.reshape(shape[:-1] + (shape[-1] // ratio, ratio)), jnp.uint32)
            out_packed = swap_axes_pallas(packed, a0, a1)
            return lax.bitcast_convert_type(out_packed, x.dtype).reshape(out_shape_full)

    # --- canonicalize: collapse contiguous untouched axis groups --------------
    B = math.prod(shape[:a0]) if a0 > 0 else 1
    A0 = shape[a0]
    M = math.prod(shape[a0 + 1:a1]) if a1 > a0 + 1 else 1
    A1 = shape[a1]
    I = math.prod(shape[a1 + 1:]) if a1 < ndim - 1 else 1

    dims, roles = [], []
    for d, role in ((B, "b"), (A0, "s0"), (M, "m"), (A1, "s1"), (I, "i")):
        if role in ("s0", "s1") or d != 1:
            dims.append(d)
            roles.append(role)
    r = len(dims)
    q0 = roles.index("s0")
    q1 = roles.index("s1")
    perm = list(range(r))
    perm[q0], perm[q1] = perm[q1], perm[q0]
    perm = tuple(perm)

    in_canon = tuple(dims)
    out_canon = tuple(in_canon[perm[p]] for p in range(r))
    lane_swap = "i" not in roles  # swap moves data into / out of the lane dim

    # --- degenerate lane swaps: a sub-128 axis on the lane side forces masked
    #     narrow stores / tiny strided reads; XLA's transpose handles these
    #     layouts better (per perf review).  Intentional, not a missing path. --
    if lane_swap and ((out_canon[-1] < 128 and out_canon[-1] % 128 != 0)
                      or (in_canon[-1] < 128 and in_canon[-1] % 128 != 0)):
        return jnp.swapaxes(x, axis0, axis1)

    # --- per-dim alignment so every block's last-two dims are legal on BOTH
    #     input and output sides; sublane requirement is dtype-aware ----------
    sublane = {4: 8, 2: 16, 1: 32}.get(itemsize, 8)

    def _req(pos):
        if pos == r - 1:
            return 128
        if pos == r - 2:
            return sublane
        return 1

    need_align = [max(_req(j), _req(perm[j])) for j in range(r)]

    # --- generation-aware VMEM / block budget: in+out blocks are each
    #     double-buffered by the pipeline => ~4x block bytes live -------------
    cap = _vmem_capacity_bytes()
    block_bytes = min(4 * 1024 * 1024, max(cap // 16, 512 * 1024))
    vmem_limit = int(min(cap * 3 // 4, 64 * 1024 * 1024))
    budget_elems = max(block_bytes // itemsize, 1)

    tiles = list(in_canon)

    def _total():
        return math.prod(tiles)

    def _shrink(j):
        others = _total() // tiles[j]
        target = max(budget_elems // max(others, 1), 1)
        tiles[j] = _round_tile(in_canon[j], need_align[j], target)

    if lane_swap:
        # Untouched batch/middle dims shrink first.
        for role in ("b", "m"):
            if _total() <= budget_elems:
                break
            if role in roles:
                _shrink(roles.index(role))
        if _total() > budget_elems:
            # Balance the swapped (A0, A1) plane: roughly square tiles so BOTH
            # the read-side and the write-side DMA keep long contiguous runs.
            others = _total() // (tiles[q0] * tiles[q1])
            rem = max(budget_elems // max(others, 1), 1)
            side = max(int(math.isqrt(rem)), 1)
            t0 = _round_tile(in_canon[q0], need_align[q0], side)
            t1 = _round_tile(in_canon[q1], need_align[q1], max(rem // max(t0, 1), 1))
            t0 = _round_tile(in_canon[q0], need_align[q0], max(rem // max(t1, 1), 1))
            tiles[q0], tiles[q1] = t0, t1
    else:
        # Lane ('i') dim shrinks LAST so reads and writes stay lane-dense.
        for role in ("b", "m", "s0", "s1", "i"):
            if _total() <= budget_elems:
                break
            if role in roles:
                _shrink(roles.index(role))

    # --- grid: cdiv, so non-divisible dims get a masked ragged edge block -----
    grid = [pl.cdiv(in_canon[j], tiles[j]) for j in range(r)]

    # --- megacore / v7x 2xTC: keep splitting until the grid has >= 4 (and an
    #     even number of) steps, so both TensorCores get balanced work ---------
    split_pref = [j for role in ("b", "m", "s0", "s1", "i")
                  for j in range(r) if roles[j] == role]
    for _ in range(4):
        p = math.prod(grid)
        if (p >= 4 and p % 2 == 0) or p >= 16:
            break
        did = False
        for j in split_pref:
            al = need_align[j]
            if tiles[j] >= 2 * al and tiles[j] >= 2:
                new_t = _round_tile(in_canon[j], al, max(tiles[j] // 2, al))
                if new_t < tiles[j]:
                    tiles[j] = new_t
                    grid[j] = pl.cdiv(in_canon[j], new_t)
                    did = True
                    break
        if not did:
            break
    grid = tuple(grid)

    in_block = tuple(tiles)
    out_block = tuple(tiles[perm[p]] for p in range(r))

    in_index = _fixed_arity(lambda *idx: tuple(idx), r)
    out_index = _fixed_arity(lambda *idx: tuple(idx[p] for p in perm), r)

    x_c = x.reshape(in_canon)  # contiguous collapse: free

    out_c = pl.pallas_call(
        _make_swap_kernel(perm),
        out_shape=jax.ShapeDtypeStruct(out_canon, x.dtype),
        grid_spec=pltpu.PrefetchScalarGridSpec(
            num_scalar_prefetch=0,
            grid=grid,
            in_specs=[pl.BlockSpec(in_block, in_index)],
            out_specs=pl.BlockSpec(out_block, out_index),
        ),
        compiler_params=pltpu.CompilerParams(
            dimension_semantics=("parallel",) * r,
            vmem_limit_bytes=vmem_limit,
        ),
        cost_estimate=pl.CostEstimate(
            flops=0,
            transcendentals=0,
            bytes_accessed=2 * x.size * itemsize,
        ),
    )(x_c)

    return out_c.reshape(out_shape_full)


class SwapAxes:
    """JAX/Pallas counterpart of the PyTorch SwapAxes module."""

    def __init__(self, axis0: int, axis1: int):
        self.axis0 = axis0
        self.axis1 = axis1

    def __call__(self, x: jax.Array) -> jax.Array:
        return swap_axes_pallas(x, self.axis0, self.axis1)


if __name__ == "__main__":
    key = jax.random.PRNGKey(0)
    k1, k2, k3, k4 = jax.random.split(key, 4)

    # 1) Non-lane swap (last dim untouched), f32, lane-dense (128-wide) output.
    x1 = jax.random.normal(k1, (2, 4, 16, 128), dtype=jnp.float32)
    out1 = jax.block_until_ready(SwapAxes(1, 2)(x1))
    ref1 = jnp.swapaxes(x1, 1, 2)
    assert out1.shape == ref1.shape and out1.dtype == ref1.dtype
    assert bool(jnp.all(out1 == ref1))

    # 2) Lane-involving swap (balanced swapped-plane tiling path), f32.
    x2 = jax.random.normal(k2, (256, 4, 128), dtype=jnp.float32)
    out2 = jax.block_until_ready(SwapAxes(0, 2)(x2))
    ref2 = jnp.swapaxes(x2, 0, 2)
    assert out2.shape == ref2.shape
    assert bool(jnp.all(out2 == ref2))

    # 3) Non-lane swap, bf16 -> wrapper-level u32 packing path.
    x3 = jax.random.normal(k3, (2, 4, 16, 256), dtype=jnp.bfloat16)
    out3 = jax.block_until_ready(SwapAxes(0, 2)(x3))
    ref3 = jnp.swapaxes(x3, 0, 2)
    assert out3.shape == ref3.shape and out3.dtype == ref3.dtype
    assert bool(jnp.all(out3 == ref3))

    # 4) Degenerate lane swap (tiny dim would land on the lane) -> XLA fallback.
    x4 = jax.random.normal(k4, (2, 4, 16, 16), dtype=jnp.float32)
    out4 = jax.block_until_ready(SwapAxes(0, 3)(x4))
    ref4 = jnp.swapaxes(x4, 0, 3)
    assert out4.shape == ref4.shape
    assert bool(jnp.all(out4 == ref4))

    print("KERNEL_OK")
</pallas_src>

<mosaic_0001>
module attributes {stable_mosaic.version = 11 : i64} {
  func.func @kernel(%arg0: i32, %arg1: i32, %arg2: i32, %arg3: i32, %arg4: memref<1x4x8x128xf32, #tpu.memory_space<vmem>>, %arg5: memref<1x8x4x128xf32, #tpu.memory_space<vmem>>) attributes {dimension_semantics = [#tpu.dimension_semantics<parallel>, #tpu.dimension_semantics<parallel>, #tpu.dimension_semantics<parallel>, #tpu.dimension_semantics<parallel>], iteration_bounds = array<i64: 2, 1, 2, 1>, scalar_prefetch = 0 : i64, scratch_operands = 0 : i64, tpu.core_type = #tpu.core_type<tc>, window_params = [{transform_indices = @transform_0, window_bounds = array<i64: 1, 4, 8, 128>}, {transform_indices = @transform_1, window_bounds = array<i64: 1, 8, 4, 128>}]} {
    %c0 = arith.constant 0 : index
    %c0_0 = arith.constant 0 : index
    %c0_1 = arith.constant 0 : index
    %c0_2 = arith.constant 0 : index
    %0 = vector.load %arg4[%c0, %c0_0, %c0_1, %c0_2] : memref<1x4x8x128xf32, #tpu.memory_space<vmem>>, vector<1x4x8x128xf32>
    %1 = tpu.transpose %0, [0, 2, 1, 3] : vector<1x4x8x128xf32> -> vector<1x8x4x128xf32>
    %c0_3 = arith.constant 0 : index
    %c0_4 = arith.constant 0 : index
    %c0_5 = arith.constant 0 : index
    %c0_6 = arith.constant 0 : index
    %2 = vector.load %arg5[%c0_3, %c0_4, %c0_5, %c0_6] : memref<1x8x4x128xf32, #tpu.memory_space<vmem>>, vector<1x8x4x128xf32>
    tpu.vector_store %arg5[%c0_3, %c0_4, %c0_5, %c0_6], %1 {strides = array<i32>} : memref<1x8x4x128xf32, #tpu.memory_space<vmem>>, vector<1x8x4x128xf32>,
    return
  }
  func.func @transform_0(%arg0: i32, %arg1: i32, %arg2: i32, %arg3: i32) -> (i32, i32, i32, i32) {
    %c0_i32 = arith.constant 0 : i32
    return %arg0, %arg1, %arg2, %arg3 : i32, i32, i32, i32
  }
  func.func @transform_1(%arg0: i32, %arg1: i32, %arg2: i32, %arg3: i32) -> (i32, i32, i32, i32) {
    %c0_i32 = arith.constant 0 : i32
    return %arg0, %arg2, %arg1, %arg3 : i32, i32, i32, i32
  }
}

</mosaic_0001>

<bundles_post_ra>
// kernel: tpu_custom_call.1
= control target key start
LH: loop header
LB: loop body
LE: loop exit
PB: predicated region body
PF: predicated region fallthrough
CT: control target
= control target key end

     0   :  { %6 = vsyncpa [#allocation3], 0  ;;  %s837_s0 = inlined_call_operand.hbm [shape: f32[2,4,16,128], index: 0, kind: input, shape index: {}]   ;;  %s838_s1 = inlined_call_operand.hbm [shape: f32[2,16,4,128], index: 1, kind: output, shape index: {}]  }
   0x1   :  { %8 = vsyncpa [#allocation3 + $0x1], 0 }
   0x2   :  { %9 = vsyncpa [#allocation4], 0 }
   0x3   :  { %11 = vsyncpa [#allocation4 + $0x1], 0  ;;  %s638_s6 = smov 0   ;;  %s640_s7 = smov 0  }
   0x4   :  { %s642_s8 = smov 0   ;;  %s644_s9 = smov 0  }
   0x5   :  { %s646_s10 = smov 0   ;;  %s648_s11 = smov 0  }
   0x6   :  { %s650_s12 = smov 0   ;;  %s652_s13 = smov 0  }
   0x7 LB: > { %s378_s14 = sadd.s32 4294967295, %s616_s13   ;;  %s379_s15 = sadd.s32 4294967294, %s616_s13   ;;  %s616_s13 = sphi %s652_s13, %s17_s13   ;;  %s612_s12 = sphi %s650_s12, %s853_s12   ;;  %s608_s11 = sphi %s648_s11, %s852_s11   ;;  %s604_s10 = sphi %s646_s10, %s851_s10   ;;  %s600_s9 = sphi %s644_s9, %s850_s9   ;;  %s596_s8 = sphi %s642_s8, %s849_s8   ;;  %s592_s7 = sphi %s640_s7, %s848_s7   ;;  %s588_s6 = sphi %s638_s6, %s847_s6  }
   0x8   : > { %s35_s16 = sadd.s32 1, %s608_s11  ;;  %s43_s17 = sadd.s32 1, %s612_s12 }
   0x9   : > { %p37_p0 = scmp.ge.s32.totalorder %s35_s16, 2  ;;  %s56_s18 = sadd.s32 1, %s596_s8 }
   0xa   : > { %p63_p1 = scmp.ne.s32.totalorder %s596_s8, %s592_s7  ;;  %p64_p2 = scmp.eq.s32.totalorder %s616_s13, 0 }
   0xb   : > { %s855_s16 = smov (%p37_p0, %s35_s16), 0  ;;  %s857_s17 = smov (!%p37_p0, %s43_s17), %s612_s12 }
   0xc   : > { %s50_s19 = ssub.s32 %s608_s11, %s855_s16  ;;  %p691_p3 = por %p64_p2, %p63_p1 }
   0xd   : > { %p45_p4 = scmp.ge.s32.totalorder %s857_s17, 2  ;;  %p69_p5 = scmp.ne.s32.totalorder %s592_s7, %s588_s6 }
   0xe   : > { %p70_p6 = scmp.eq.s32.totalorder %s378_s14, 0  ;;  %p99_p7 = scmp.eq.s32.totalorder %s378_s14, 3 }
   0xf   : > { %s859_s17 = smov (%p45_p4, %s857_s17), 0  ;;  %p105_p10 = scmp.eq.s32.totalorder %s379_s15, 3 }
  0x10   : > { %p699_p8 = por %p70_p6, %p69_p5  ;;  %p703_p9 = por %p99_p7, %p63_p1 }
  0x11   : > { %s47_s23 = ssub.s32 %s612_s12, %s859_s17  ;;  %p709_p12 = por %p105_p10, %p69_p5 }
  0x12   : > { %s842_s22 = scalar_select %p703_p9, 1, 0 }
  0x13   : > { %s51_s24 = sor.u32 %s50_s19, %s47_s23  ;;  %p410_p13 = scmp.lt.s32.totalorder %s616_s13, 4 }
  0x14   : > { %p54_p11 = scmp.eq.s32.totalorder %s51_s24, 0  ;;  %s125_s26 = sand.u32 1, %s596_s8  }
  0x15   : > { %s843_s25 = scalar_select %p709_p12, 1, 0 }
  0x16   : > { %s716_s27 = scalar_select %p54_p11, %s596_s8, %s56_s18  }
  0x17   : > { %s382_s28 = sshll.u32 %s125_s26, 5  ;;  %s383_s29 = sshll.u32 %s612_s12, 3 }
  0x18   : > { %s138_s30 = sadd.s32 %s608_s11, %s383_s29  ;;  %s129_s2 = scalar_lea.vmem [#allocation2], %s382_s28 }
  0x19   : > { %s141_s3 = sshll.u32 %s129_s2, 4  ;;  %s384_s4 = sshll.u32 %s138_s30, 7  ;;  %s720_s3 = int_to_ptr.vmem [resolvable:$true] %s141_s3 }
  0x1a   : > { %s725_s15 = scalar_lea.hbm %s837_s0, %s384_s4  ;;  %p729_p0 = pnand %p410_p13, %p691_p3 }
  0x1b   : > { %s733_s19 = scalar_lea.sflag [#allocation3], %s125_s26  ;;  %s488_s23 = scalar_lea.hbm %s725_s15, 512 }
  0x1c   : > { %p489_p1 = scmp.ne.s32.totalorder %s725_s15, %s488_s23  ;;  %p490_p2 = pneg %p729_p0 }
  0x1d   : > { %s493_s28 = scalar_lea.hbm %s837_s0, 2048  ;;  %p494_p3 = scmp.lt.u32.totalorder %s725_s15, %s837_s0 }
  0x1e   : > { %p491_p4 = pnand %p490_p2, %p489_p1  ;;  %p495_p6 = scmp.lt.u32.totalorder %s493_s28, %s488_s23 }
  0x1f   : > { %p497_p10 = scmp.lt.u32.totalorder %s488_s23, %s725_s15 }
  0x20   : > { %p492_p5 = pneg %p491_p4  ;;  %p496_p7 = por %p495_p6, %p494_p3 }
  0x22   : > { %p498_p11 = por %p497_p10, %p496_p7 }
  0x24   : > { %p499_p13 = pnand %p498_p11, %p492_p5 }
  0x26   : > { %502 = shalt.err (!%p499_p13)
}
  0x27   : > { %s503_s26 = scalar_lea.vmem %s720_s3, 512  ;;  %s618_s2 = smov [#allocation2]  }
  0x28   : > { %p504_p1 = scmp.ne.s32.totalorder %s720_s3, %s503_s26  ;;  %s508_s4 = sshll.u32 %s618_s2, 4  ;;  %s509_s4 = int_to_ptr.vmem [resolvable:$false] %s508_s4 }
  0x29   : > { %s510_s5 = scalar_lea.vmem %s509_s4, 1024  ;;  %p511_p9 = scmp.lt.s32.totalorder %s720_s3, %s509_s4 }
  0x2a   : > { %p506_p4 = pnand %p504_p1, %p490_p2  ;;  %p512_p3 = scmp.lt.s32.totalorder %s510_s5, %s503_s26 }
  0x2c   : > { %p507_p12 = pneg %p506_p4  ;;  %p513_p6 = por %p512_p3, %p511_p9 }
  0x2e   : > { %p514_p7 = pnand %p513_p6, %p507_p12 }
  0x30   : > { %517 = shalt.err (!%p514_p7)
}
  0x31   : > { %s619_s14 = smov 256   ;;  %s620_s23 = smov 128  }
  0x32   : > { %s621_s20 = smov 8   ;;  %p385_p2 = scmp.ge.s32.totalorder %s616_s13, 1 }
  0x33   : > { %405 = dma.hbm_to_vmem [thread:$0]  (!%p729_p0), %s725_s15, 512, %s720_s3, %s733_s19, %s619_s14, %s620_s23, %s621_s20  }
  0x34   : > { %p149_p5 = scmp.lt.s32.totalorder %s616_s13, 5 }
  0x36   : > { %p150_p10 = pnand %p385_p2, %p149_p5 }
  0x37   : > { %s764_s24 = sand.u32 (!%p150_p10), 1, %s592_s7  }
  0x38   : > { %153 = sbr.rel (%p150_p10) target bundleno = 95 (0x5f), region = 24  ;;  %s386_s28 = sshll.u32 (!%p150_p10), %s764_s24, 5 }
  0x39   : > { %s156_s29 = scalar_lea.sflag (!%p150_p10), [#allocation3], %s764_s24  ;;  %s159_s30 = scalar_lea.vmem (!%p150_p10), [#allocation2], %s386_s28 }
  0x3f   : > { %579 = dma.done.wait (%p699_p8), %s156_s29, 512  }
  0x40   : > { %581 = vsyncadd (%p699_p8), %s156_s29, 4294966784  ;;  %v189_v0 = vlaneseq  ;;  %v622_v1 = vmov 1983009808   ;;  %v623_v4 = vmov 1934713408   ;;  %v180_v9 = vld [vmem:[%s159_s30] sm:$0xff] }
  0x41   : > { %v187_v2 = vunpack.c.l.s4 %v622_v1  ;;  %v219_v5 = vunpack.c.l.s4 %v623_v4  ;;  %v181_v10 = vld [vmem:[%s159_s30 + $0x8] sm:$0xff]  ;;  %v182_v11 = vld [vmem:[%s159_s30 + $0x10] sm:$0xff]  ;;  %s393_s3 = sshll.u32 %s600_s9, 3  ;;  %v183_v12 = vld [vmem:[%s159_s30 + $0x18] sm:$0xff]  ;;  %s394_s21 = sshll.u32 %s604_s10, 4  ;;  %v624_v30 = vmov 0.0  }
  0x42   : > { %v190_v3 = vshrl.u32 %v189_v0, 7  ;;  %v484_v13 = vld [vmem:[%s159_s30] ss:$16 sps:$4 sm:$0xff]   ;;  %v486_v14 = vld [vmem:[%s159_s30 + $0x8] ss:$16 sps:$4 sm:$0xff]   ;;  %v185_v15 = vcombine.high %v180_v9, %v182_v11  ;;  %v201_v16 = vcombine.high %v181_v10, %v183_v12  ;;  %s275_s15 = sadd.s32 %s394_s21, %s393_s3  ;;  %s177_s18 = scalar_lea.vmem [#allocation5], %s386_s28 }
  0x43   : > { %v188_v6 = vunpack.c.0.s8 %v187_v2  ;;  %v220_v8 = vunpack.c.0.s8 %v219_v5  ;;  %s278_s19 = sshll.u32 %s177_s18, 4  ;;  %s395_s9 = sshll.u32 %s275_s15, 6  ;;  %s778_s19 = int_to_ptr.vmem [resolvable:$true] %s278_s19 }
  0x44   : > { %s783_s2 = scalar_lea.hbm %s838_s1, %s395_s9  ;;  %s261_s4 = scalar_lea.sflag [#allocation4], %s764_s24 }
  0x45   : > { %v191_v7 = vsub.s32 %v188_v6, %v190_v3  ;;  %v223_v19 = vsub.s32 %v220_v8, %v190_v3  ;;  %s518_s5 = scalar_lea.vmem %s778_s19, 512  ;;  %p845_p9 = scmp.ne.s32.totalorder %s842_s22, 0 }
  0x46   : > { %p519_p8 = scmp.ne.s32.totalorder %s778_s19, %s518_s5  ;;  %s625_s14 = smov [#allocation5]  }
  0x47   : > { %v192_v17 = vrot.slane %v484_v13, %v191_v7  ;;  %v208_v18 = vrot.slane %v486_v14, %v191_v7  ;;  %v199_v20 = vrot.slane %v185_v15, %v191_v7  ;;  %v215_v21 = vrot.slane %v201_v16, %v191_v7  ;;  %s522_s23 = sshll.u32 %s625_s14, 4  ;;  %s523_s23 = int_to_ptr.vmem [resolvable:$false] %s522_s23 }
  0x48   : > { %p520_p12 = pnand %p519_p8, %p845_p9  ;;  %s524_s20 = scalar_lea.vmem %s523_s23, 1024 }
  0x49   : > { %v216_v22 = vcombine.low %v192_v17, %v208_v18  ;;  %v217_v23 = vcombine.high %v192_v17, %v208_v18  ;;  %v232_v24 = vcombine.low %v199_v20, %v215_v21  ;;  %v233_v25 = vcombine.high %v199_v20, %v215_v21  ;;  %p525_p11 = scmp.lt.s32.totalorder %s778_s19, %s523_s23  ;;  %p526_p13 = scmp.lt.s32.totalorder %s524_s20, %s518_s5 }
  0x4a   : > { %p521_p0 = pneg %p520_p12 }
  0x4b   : > { %388 = vst.sshfl [vmem:[%s177_s18] sm:$0x55 pattern:$0x73516240] %v216_v22  ;;  %v224_v26 = vrot.slane %v216_v22, %v223_v19  ;;  %v231_v27 = vrot.slane %v217_v23, %v223_v19  ;;  %v240_v28 = vrot.slane %v232_v24, %v223_v19  ;;  %v247_v29 = vrot.slane %v233_v25, %v223_v19  ;;  %p527_p1 = por %p526_p13, %p525_p11 }
  0x4c   : > { %389 = vst.sshfl [vmem:[%s177_s18 + $0x8] sm:$0x55 pattern:$0x73516240] %v217_v23 }
  0x4d   : > { %390 = vst.sshfl [vmem:[%s177_s18 + $0x10] sm:$0x55 pattern:$0x73516240] %v232_v24  ;;  %v248_v31 = vcombine.high %v224_v26, %v624_v30  ;;  %v249_v32 = vcombine.high %v231_v27, %v624_v30  ;;  %v250_v33 = vcombine.high %v240_v28, %v624_v30  ;;  %v251_v34 = vcombine.high %v247_v29, %v624_v30  ;;  %p528_p4 = pnand %p527_p1, %p521_p0 }
  0x4e   : > { %391 = vst.sshfl [vmem:[%s177_s18 + $0x18] sm:$0x55 pattern:$0x73516240] %v233_v25 }
  0x4f   : > { %253 = vst [vmem:[%s177_s18 + $0x4] sm:$0xf] %v248_v31  ;;  %255 = vst [vmem:[%s177_s18 + $0xc] sm:$0xf] %v249_v32 }
  0x50   : > { %257 = vst [vmem:[%s177_s18 + $0x14] sm:$0xf] %v250_v33  ;;  %259 = vst [vmem:[%s177_s18 + $0x1c] sm:$0xf] %v251_v34 }
  0x51   : > { %531 = shalt.err (!%p528_p4)
}
  0x52   : > { %s532_s28 = scalar_lea.hbm %s783_s2, 512  ;;  %s536_s3 = scalar_lea.hbm %s838_s1, 2048 }
  0x53   : > { %p533_p3 = scmp.ne.s32.totalorder %s783_s2, %s532_s28  ;;  %p537_p2 = scmp.lt.u32.totalorder %s783_s2, %s838_s1 }
  0x54   : > { %p538_p5 = scmp.lt.u32.totalorder %s536_s3, %s532_s28  ;;  %p540_p8 = scmp.lt.u32.totalorder %s532_s28, %s783_s2 }
  0x55   : > { %p534_p6 = pnand %p533_p3, %p845_p9 }
  0x56   : > { %p539_p10 = por %p538_p5, %p537_p2 }
  0x57   : > { %p535_p7 = pneg %p534_p6 }
  0x58   : > { %p541_p12 = por %p540_p8, %p539_p10 }
  0x5a   : > { %p542_p0 = pnand %p541_p12, %p535_p7 }
  0x5c   : > { %545 = shalt.err (!%p542_p0)
}
  0x5d   : > { %s626_s18 = smov 64   ;;  %s627_s9 = smov 4  }
  0x5e   : > { %400 = dma.vmem_to_hbm [thread:$0]  (%p845_p9), %s778_s19, 512, %s783_s2, %s261_s4, %s626_s18, %s626_s18, %s627_s9  }
  0x5f PF: > { %p411_p11 = scmp.ge.s32.totalorder %s616_s13, 2  ;;  %s293_s10 = sand.u32 1, %s588_s6  }
  0x60   : > { %p846_p13 = scmp.ne.s32.totalorder %s843_s25, 0  ;;  %s294_s26 = scalar_lea.sflag [#allocation4], %s293_s10 }
  0x62   : > { %p407_p1 = pnand %p411_p11, %p846_p13 }
  0x64   : > { %583 = dma.done.wait (!%p407_p1), %s294_s26, 512  }
  0x65   : > { %585 = vsyncadd (!%p407_p1), %s294_s26, 4294966784  ;;  %s17_s13 = sadd.s32 1, %s616_s13   ;;  %s847_s6 = smov %s592_s7 }
  0x66   : > { %p14_p4 = scmp.ge.s32.totalorder %s17_s13, 6   ;;  %s848_s7 = smov %s596_s8 }
  0x67   : > { %s849_s8 = smov %s716_s27  ;;  %s850_s9 = smov %s608_s11 }
  0x68   : > { %s851_s10 = smov %s612_s12  ;;  %s852_s11 = smov %s855_s16 }
  0x69   : > { %s853_s12 = smov %s859_s17  ;;  %16 = sbr.rel (!%p14_p4) target bundleno = 7 (0x7), region = 69 }
  0x70   :  { %299 = vsyncpa [#allocation3], 1 }
  0x71   :  { %301 = vsyncpa [#allocation3 + $0x1], 1 }
  0x72   :  { %302 = vsyncpa [#allocation4], 1 }
  0x73   :  { %304 = vsyncpa [#allocation4 + $0x1], 1 }

</bundles_post_ra>
